<compile_context>
chip_gen: v7x
topology: tpu7x:2x2x1
jax: 0.10.0
libtpu: 0.0.40
codegen_flags: <defaults>
</compile_context>

<pallas_src>
import jax
import jax.numpy as jnp
from jax import lax
from jax.experimental import pallas as pl
from jax.experimental.pallas import tpu as pltpu

_LANE = 128


def _round_up(x, m):
    return ((x + m - 1) // m) * m


def _choose_k_tile(cin2, cout2, kp, budget_bytes=20 * 1024 * 1024):
    """Largest multiple-of-128 K tile whose double-buffered f32 working set
    (weight + x + out tiles) fits `budget_bytes` (sized for v7x's 64 MiB VMEM)."""
    per_k = 4 * 2 * (cin2 * cout2 + cin2 + cout2)   # bytes per K lane, double-buffered f32
    tk = (budget_bytes // per_k) // _LANE * _LANE
    tk = max(_LANE, tk)
    return min(tk, kp)


# ----------------------------------------------------------------------------
# Pallas kernel
# ----------------------------------------------------------------------------
def _mode_contract_kernel(x_ref, w_ref, o_ref):
    """Packed complex mode contraction for one (K-tile, batch) grid step.

    x_ref : (2*Cin, TK)          stacked [Re(x_ft); Im(x_ft)] retained modes
    w_ref : (2*Cin, 2*Cout, TK)  packed weights [[wr, wi], [-wi, wr]]
    o_ref : (2*Cout, TK)         stacked [Re(out_ft); Im(out_ft)]

    out[o, k] = sum_i x[i, k] * w[i, o, k] in real arithmetic; the weight
    packing encodes the complex (a+ib)(c+id) product.  Accumulator form keeps
    only one (2*Cout, TK) f32 accumulator live.
    """
    cin2 = x_ref.shape[0]

    def body(i, acc):
        # (1, TK) row of x, sublane-broadcast against this channel's weights.
        return acc + x_ref[pl.ds(i, 1), :] * w_ref[i]

    acc = lax.fori_loop(0, cin2, body,
                        jnp.zeros(o_ref.shape, jnp.float32), unroll=True)
    o_ref[...] = acc


# ----------------------------------------------------------------------------
# Wrapper
# ----------------------------------------------------------------------------
def _contract_modes_pallas(x_stacked, w_packed, tk):
    """out[b, o, k] = sum_i x_stacked[b, i, k] * w_packed[i, o, k]."""
    B, cin2, Kp = x_stacked.shape
    cout2 = w_packed.shape[1]
    assert w_packed.shape == (cin2, cout2, Kp)
    assert Kp % tk == 0 and tk % _LANE == 0
    nk = Kp // tk

    # Explicit VMEM accounting: double-buffered f32 tiles for w, x, out + headroom.
    buf_bytes = 2 * 4 * tk * (cin2 * cout2 + cin2 + cout2)
    vmem_limit = min(48 * 1024 * 1024, buf_bytes + 16 * 1024 * 1024)

    return pl.pallas_call(
        _mode_contract_kernel,
        out_shape=jax.ShapeDtypeStruct((B, cout2, Kp), jnp.float32),
        # K-tiles outer, batch inner: the weight block index only depends on
        # the outer axis, so the weight tile stays resident across the b loop.
        grid=(nk, B),
        in_specs=[
            pl.BlockSpec((None, cin2, tk), lambda k, b: (b, 0, k)),
            pl.BlockSpec((cin2, cout2, tk), lambda k, b: (0, 0, k)),
        ],
        out_specs=pl.BlockSpec((None, cout2, tk), lambda k, b: (b, 0, k)),
        compiler_params=pltpu.CompilerParams(
            dimension_semantics=("parallel", "parallel"),
            vmem_limit_bytes=int(vmem_limit)),
    )(x_stacked, w_packed)


class MainSpectralConv2d:
    """Jointly-parameterized 2D spectral conv (the "mother" conv)."""

    def __init__(self, in_channels, out_channels, modes1, modes2, n_layers, key):
        self.in_channels = in_channels
        self.out_channels = out_channels
        self.modes1 = modes1
        self.modes2 = modes2
        self.n_layers = n_layers

        K = 2 * modes1 * modes2                      # two frequency corners, flattened
        self.K = K
        cin2, cout2 = 2 * in_channels, 2 * out_channels
        # Lane-dense layout: pad K to a multiple of 128 and of the chosen K tile.
        kp0 = _round_up(K, _LANE)
        self.tk = _choose_k_tile(cin2, cout2, kp0)
        self.Kp = _round_up(kp0, self.tk)

        scale = 1.0 / (in_channels * out_channels)
        k1, k2, k3 = jax.random.split(key, 3)
        # canonical complex weights stored as separate real / imag parts
        self.weight_r = scale * jax.random.normal(
            k1, (n_layers, in_channels, out_channels, K), dtype=jnp.float32)
        self.weight_i = scale * jax.random.normal(
            k2, (n_layers, in_channels, out_channels, K), dtype=jnp.float32)
        self.bias = 0.1 * jax.random.normal(
            k3, (n_layers, out_channels), dtype=jnp.float32)

        # Pre-pack the complex weights once (shared by every SubConv view):
        #   W = [[wr,  wi],
        #        [-wi, wr]]   over (input-channel, output-channel) blocks,
        # so the in-kernel contraction is one real reduction over 2*Cin that
        # produces [Re(out); Im(out)] stacked along output channels.
        wr, wi = self.weight_r, self.weight_i
        top = jnp.concatenate([wr, wi], axis=2)          # (L, Cin, 2Cout, K)
        bot = jnp.concatenate([-wi, wr], axis=2)         # (L, Cin, 2Cout, K)
        w_packed = jnp.concatenate([top, bot], axis=1)   # (L, 2Cin, 2Cout, K)
        self.weight_packed = jnp.pad(
            w_packed, ((0, 0), (0, 0), (0, 0), (0, self.Kp - K)))

    def forward(self, x, indices):
        B, Cin, H, W = x.shape
        m1, m2 = self.modes1, self.modes2
        Cout = self.out_channels
        K, Kp = self.K, self.Kp
        W_half = W // 2 + 1

        # 1) forward real FFT (glue, no Pallas equivalent)
        x_ft = jnp.fft.rfftn(x, axes=(-2, -1))            # (B, Cin, H, W_half) c64

        # gather both retained low-frequency corners in one pass; stack real/imag
        # along channels so the kernel gets a single lane-dense f32 feed
        corners = jnp.concatenate(
            [x_ft[:, :, :m1, :m2], x_ft[:, :, H - m1:, :m2]], axis=2
        ).reshape(B, Cin, K)
        x_stacked = jnp.concatenate(
            [jnp.real(corners), jnp.imag(corners)], axis=1).astype(jnp.float32)
        x_stacked = jnp.pad(x_stacked, ((0, 0), (0, 0), (0, Kp - K)))

        # 2) spectral mode contraction -- Pallas kernel (hot path)
        out = _contract_modes_pallas(x_stacked, self.weight_packed[indices], self.tk)
        out_c = (out[:, :Cout, :K] + 1j * out[:, Cout:, :K]
                 ).reshape(B, Cout, 2 * m1, m2)

        # 3) rebuild the half-spectrum with a single concat + pad
        out_ft = jnp.concatenate(
            [out_c[:, :, :m1],
             jnp.zeros((B, Cout, H - 2 * m1, m2), out_c.dtype),
             out_c[:, :, m1:]], axis=2)
        out_ft = jnp.pad(out_ft, ((0, 0), (0, 0), (0, 0), (0, W_half - m2)))

        # 4) inverse FFT + per-layer channel bias (bias left to XLA so it fuses
        #    into the irfft epilogue -- no extra HBM round trip)
        y = jnp.fft.irfftn(out_ft, s=(H, W), axes=(-2, -1)).astype(jnp.float32)
        return y + self.bias[indices][None, :, None, None]


class SubConv:
    """One layer-view of the mother joint factorized spectral convolution."""

    def __init__(self, main_conv, indices):
        self.main_conv = main_conv
        self.indices = indices

    def __call__(self, x):
        return self.main_conv.forward(x, self.indices)


# ----------------------------------------------------------------------------
# Pure-JAX reference for verification
# ----------------------------------------------------------------------------
def _reference(main, x, indices):
    B, Cin, H, W = x.shape
    m1, m2 = main.modes1, main.modes2
    Cout = main.out_channels
    x_ft = jnp.fft.rfftn(x, axes=(-2, -1))
    c1 = x_ft[:, :, :m1, :m2].reshape(B, Cin, -1)
    c2 = x_ft[:, :, -m1:, :m2].reshape(B, Cin, -1)
    x_modes = jnp.concatenate([c1, c2], axis=-1)
    w = main.weight_r[indices] + 1j * main.weight_i[indices]
    out_modes = jnp.einsum('bik,iok->bok', x_modes, w)
    W_half = W // 2 + 1
    half = m1 * m2
    out_ft = jnp.zeros((B, Cout, H, W_half), dtype=jnp.complex64)
    out_ft = out_ft.at[:, :, :m1, :m2].set(
        out_modes[:, :, :half].reshape(B, Cout, m1, m2))
    out_ft = out_ft.at[:, :, -m1:, :m2].set(
        out_modes[:, :, half:].reshape(B, Cout, m1, m2))
    y = jnp.fft.irfftn(out_ft, s=(H, W), axes=(-2, -1)).astype(jnp.float32)
    return y + main.bias[indices][None, :, None, None]


# ----------------------------------------------------------------------------
if __name__ == "__main__":
    B, Cin, Cout, H, W = 2, 4, 4, 16, 16
    modes1, modes2, n_layers = 4, 4, 3
    indices = 1  # this SubConv owns layer 1 of the mother conv

    key = jax.random.PRNGKey(0)
    kx, kw = jax.random.split(key)
    x = jax.random.normal(kx, (B, Cin, H, W), dtype=jnp.float32)

    main_conv = MainSpectralConv2d(Cin, Cout, modes1, modes2, n_layers, kw)
    sub_conv = SubConv(main_conv, indices)

    y = sub_conv(x)
    y = jax.block_until_ready(y)

    y_ref = _reference(main_conv, x, indices)
    assert y.shape == (B, Cout, H, W)
    assert jnp.allclose(y, y_ref, atol=1e-4, rtol=1e-4), "mismatch vs reference"

    print("KERNEL_OK")
</pallas_src>

<mosaic_0001>
module attributes {stable_mosaic.version = 11 : i64} {
  func.func @_mode_contract_kernel(%arg0: i32, %arg1: i32, %arg2: memref<1x8x128xf32, #tpu.memory_space<vmem>>, %arg3: memref<8x8x128xf32, #tpu.memory_space<vmem>>, %arg4: memref<1x8x128xf32, #tpu.memory_space<vmem>>) attributes {dimension_semantics = [#tpu.dimension_semantics<parallel>, #tpu.dimension_semantics<parallel>], iteration_bounds = array<i64: 1, 2>, scalar_prefetch = 0 : i64, scratch_operands = 0 : i64, tpu.core_type = #tpu.core_type<tc>, window_params = [{transform_indices = @transform_0, window_bounds = array<i64: 1, 8, 128>}, {transform_indices = @transform_1, window_bounds = array<i64: 8, 8, 128>}, {transform_indices = @transform_2, window_bounds = array<i64: 1, 8, 128>}]} {
    %cst = arith.constant 0.000000e+00 : f32
    %0 = vector.broadcast %cst : f32 to vector<8x128xf32>
    %c0_i32 = arith.constant 0 : i32
    %c0 = arith.constant 0 : index
    %1 = arith.index_cast %c0_i32 : i32 to index
    %c0_0 = arith.constant 0 : index
    %2 = vector.load %arg2[%c0, %1, %c0_0] : memref<1x8x128xf32, #tpu.memory_space<vmem>>, vector<1x1x128xf32>
    %3 = vector.shape_cast %2 : vector<1x1x128xf32> to vector<1x128xf32>
    %4 = arith.index_cast %c0_i32 : i32 to index
    %c0_1 = arith.constant 0 : index
    %c0_2 = arith.constant 0 : index
    %5 = vector.load %arg3[%4, %c0_1, %c0_2] : memref<8x8x128xf32, #tpu.memory_space<vmem>>, vector<1x8x128xf32>
    %6 = vector.shape_cast %5 : vector<1x8x128xf32> to vector<8x128xf32>
    %7 = vector.broadcast %3 : vector<1x128xf32> to vector<8x128xf32>
    %8 = arith.mulf %7, %6 : vector<8x128xf32>
    %9 = arith.addf %0, %8 : vector<8x128xf32>
    %c1_i32 = arith.constant 1 : i32
    %c0_3 = arith.constant 0 : index
    %10 = arith.index_cast %c1_i32 : i32 to index
    %c0_4 = arith.constant 0 : index
    %11 = vector.load %arg2[%c0_3, %10, %c0_4] : memref<1x8x128xf32, #tpu.memory_space<vmem>>, vector<1x1x128xf32>
    %12 = vector.shape_cast %11 : vector<1x1x128xf32> to vector<1x128xf32>
    %13 = arith.index_cast %c1_i32 : i32 to index
    %c0_5 = arith.constant 0 : index
    %c0_6 = arith.constant 0 : index
    %14 = vector.load %arg3[%13, %c0_5, %c0_6] : memref<8x8x128xf32, #tpu.memory_space<vmem>>, vector<1x8x128xf32>
    %15 = vector.shape_cast %14 : vector<1x8x128xf32> to vector<8x128xf32>
    %16 = vector.broadcast %12 : vector<1x128xf32> to vector<8x128xf32>
    %17 = arith.mulf %16, %15 : vector<8x128xf32>
    %18 = arith.addf %9, %17 : vector<8x128xf32>
    %c2_i32 = arith.constant 2 : i32
    %c0_7 = arith.constant 0 : index
    %19 = arith.index_cast %c2_i32 : i32 to index
    %c0_8 = arith.constant 0 : index
    %20 = vector.load %arg2[%c0_7, %19, %c0_8] : memref<1x8x128xf32, #tpu.memory_space<vmem>>, vector<1x1x128xf32>
    %21 = vector.shape_cast %20 : vector<1x1x128xf32> to vector<1x128xf32>
    %22 = arith.index_cast %c2_i32 : i32 to index
    %c0_9 = arith.constant 0 : index
    %c0_10 = arith.constant 0 : index
    %23 = vector.load %arg3[%22, %c0_9, %c0_10] : memref<8x8x128xf32, #tpu.memory_space<vmem>>, vector<1x8x128xf32>
    %24 = vector.shape_cast %23 : vector<1x8x128xf32> to vector<8x128xf32>
    %25 = vector.broadcast %21 : vector<1x128xf32> to vector<8x128xf32>
    %26 = arith.mulf %25, %24 : vector<8x128xf32>
    %27 = arith.addf %18, %26 : vector<8x128xf32>
    %c3_i32 = arith.constant 3 : i32
    %c0_11 = arith.constant 0 : index
    %28 = arith.index_cast %c3_i32 : i32 to index
    %c0_12 = arith.constant 0 : index
    %29 = vector.load %arg2[%c0_11, %28, %c0_12] : memref<1x8x128xf32, #tpu.memory_space<vmem>>, vector<1x1x128xf32>
    %30 = vector.shape_cast %29 : vector<1x1x128xf32> to vector<1x128xf32>
    %31 = arith.index_cast %c3_i32 : i32 to index
    %c0_13 = arith.constant 0 : index
    %c0_14 = arith.constant 0 : index
    %32 = vector.load %arg3[%31, %c0_13, %c0_14] : memref<8x8x128xf32, #tpu.memory_space<vmem>>, vector<1x8x128xf32>
    %33 = vector.shape_cast %32 : vector<1x8x128xf32> to vector<8x128xf32>
    %34 = vector.broadcast %30 : vector<1x128xf32> to vector<8x128xf32>
    %35 = arith.mulf %34, %33 : vector<8x128xf32>
    %36 = arith.addf %27, %35 : vector<8x128xf32>
    %c4_i32 = arith.constant 4 : i32
    %c0_15 = arith.constant 0 : index
    %37 = arith.index_cast %c4_i32 : i32 to index
    %c0_16 = arith.constant 0 : index
    %38 = vector.load %arg2[%c0_15, %37, %c0_16] : memref<1x8x128xf32, #tpu.memory_space<vmem>>, vector<1x1x128xf32>
    %39 = vector.shape_cast %38 : vector<1x1x128xf32> to vector<1x128xf32>
    %40 = arith.index_cast %c4_i32 : i32 to index
    %c0_17 = arith.constant 0 : index
    %c0_18 = arith.constant 0 : index
    %41 = vector.load %arg3[%40, %c0_17, %c0_18] : memref<8x8x128xf32, #tpu.memory_space<vmem>>, vector<1x8x128xf32>
    %42 = vector.shape_cast %41 : vector<1x8x128xf32> to vector<8x128xf32>
    %43 = vector.broadcast %39 : vector<1x128xf32> to vector<8x128xf32>
    %44 = arith.mulf %43, %42 : vector<8x128xf32>
    %45 = arith.addf %36, %44 : vector<8x128xf32>
    %c5_i32 = arith.constant 5 : i32
    %c0_19 = arith.constant 0 : index
    %46 = arith.index_cast %c5_i32 : i32 to index
    %c0_20 = arith.constant 0 : index
    %47 = vector.load %arg2[%c0_19, %46, %c0_20] : memref<1x8x128xf32, #tpu.memory_space<vmem>>, vector<1x1x128xf32>
    %48 = vector.shape_cast %47 : vector<1x1x128xf32> to vector<1x128xf32>
    %49 = arith.index_cast %c5_i32 : i32 to index
    %c0_21 = arith.constant 0 : index
    %c0_22 = arith.constant 0 : index
    %50 = vector.load %arg3[%49, %c0_21, %c0_22] : memref<8x8x128xf32, #tpu.memory_space<vmem>>, vector<1x8x128xf32>
    %51 = vector.shape_cast %50 : vector<1x8x128xf32> to vector<8x128xf32>
    %52 = vector.broadcast %48 : vector<1x128xf32> to vector<8x128xf32>
    %53 = arith.mulf %52, %51 : vector<8x128xf32>
    %54 = arith.addf %45, %53 : vector<8x128xf32>
    %c6_i32 = arith.constant 6 : i32
    %c0_23 = arith.constant 0 : index
    %55 = arith.index_cast %c6_i32 : i32 to index
    %c0_24 = arith.constant 0 : index
    %56 = vector.load %arg2[%c0_23, %55, %c0_24] : memref<1x8x128xf32, #tpu.memory_space<vmem>>, vector<1x1x128xf32>
    %57 = vector.shape_cast %56 : vector<1x1x128xf32> to vector<1x128xf32>
    %58 = arith.index_cast %c6_i32 : i32 to index
    %c0_25 = arith.constant 0 : index
    %c0_26 = arith.constant 0 : index
    %59 = vector.load %arg3[%58, %c0_25, %c0_26] : memref<8x8x128xf32, #tpu.memory_space<vmem>>, vector<1x8x128xf32>
    %60 = vector.shape_cast %59 : vector<1x8x128xf32> to vector<8x128xf32>
    %61 = vector.broadcast %57 : vector<1x128xf32> to vector<8x128xf32>
    %62 = arith.mulf %61, %60 : vector<8x128xf32>
    %63 = arith.addf %54, %62 : vector<8x128xf32>
    %c7_i32 = arith.constant 7 : i32
    %c0_27 = arith.constant 0 : index
    %64 = arith.index_cast %c7_i32 : i32 to index
    %c0_28 = arith.constant 0 : index
    %65 = vector.load %arg2[%c0_27, %64, %c0_28] : memref<1x8x128xf32, #tpu.memory_space<vmem>>, vector<1x1x128xf32>
    %66 = vector.shape_cast %65 : vector<1x1x128xf32> to vector<1x128xf32>
    %67 = arith.index_cast %c7_i32 : i32 to index
    %c0_29 = arith.constant 0 : index
    %c0_30 = arith.constant 0 : index
    %68 = vector.load %arg3[%67, %c0_29, %c0_30] : memref<8x8x128xf32, #tpu.memory_space<vmem>>, vector<1x8x128xf32>
    %69 = vector.shape_cast %68 : vector<1x8x128xf32> to vector<8x128xf32>
    %70 = vector.broadcast %66 : vector<1x128xf32> to vector<8x128xf32>
    %71 = arith.mulf %70, %69 : vector<8x128xf32>
    %72 = arith.addf %63, %71 : vector<8x128xf32>
    %c8_i32 = arith.constant 8 : i32
    %c0_31 = arith.constant 0 : index
    %c0_32 = arith.constant 0 : index
    %c0_33 = arith.constant 0 : index
    %73 = vector.load %arg4[%c0_31, %c0_32, %c0_33] : memref<1x8x128xf32, #tpu.memory_space<vmem>>, vector<1x8x128xf32>
    %74 = vector.shape_cast %73 : vector<1x8x128xf32> to vector<8x128xf32>
    %75 = vector.shape_cast %72 : vector<8x128xf32> to vector<1x8x128xf32>
    tpu.vector_store %arg4[%c0_31, %c0_32, %c0_33], %75 {strides = array<i32>} : memref<1x8x128xf32, #tpu.memory_space<vmem>>, vector<1x8x128xf32>,
    return
  }
  func.func @transform_0(%arg0: i32, %arg1: i32) -> (i32, i32, i32) {
    %c0_i32 = arith.constant 0 : i32
    %c0_i32_0 = arith.constant 0 : i32
    return %arg1, %c0_i32, %arg0 : i32, i32, i32
  }
  func.func @transform_1(%arg0: i32, %arg1: i32) -> (i32, i32, i32) {
    %c0_i32 = arith.constant 0 : i32
    %c0_i32_0 = arith.constant 0 : i32
    %c0_i32_1 = arith.constant 0 : i32
    return %c0_i32, %c0_i32_0, %arg0 : i32, i32, i32
  }
  func.func @transform_2(%arg0: i32, %arg1: i32) -> (i32, i32, i32) {
    %c0_i32 = arith.constant 0 : i32
    %c0_i32_0 = arith.constant 0 : i32
    return %arg1, %c0_i32, %arg0 : i32, i32, i32
  }
}

</mosaic_0001>

<bundles_post_ra>
// kernel: tpu_custom_call.1
= control target key start
LH: loop header
LB: loop body
LE: loop exit
PB: predicated region body
PF: predicated region fallthrough
CT: control target
= control target key end

     0   :  { %7 = vsyncpa [#allocation3], 0  ;;  %s859_s0 = inlined_call_operand.hbm [shape: f32[2,8,128], index: 0, kind: input, shape index: {}]   ;;  %s860_s1 = inlined_call_operand.hbm [shape: f32[8,8,128], index: 1, kind: input, shape index: {}]   ;;  %s861_s2 = inlined_call_operand.hbm [shape: f32[2,8,128], index: 2, kind: output, shape index: {}]  }
   0x1   :  { %9 = vsyncpa [#allocation3 + $0x1], 0 }
   0x2   :  { %10 = vsyncpa [#allocation6], 0 }
   0x3   :  { %11 = vsyncpa [#allocation4], 0 }
   0x4   :  { %13 = vsyncpa [#allocation4 + $0x1], 0  ;;  %s641_s9 = smov 0   ;;  %s643_s10 = smov 0  }
   0x5   :  { %s645_s11 = smov 0   ;;  %s647_s12 = smov 0  }
   0x6   :  { %s649_s13 = smov 0   ;;  %s651_s14 = smov 0  }
   0x7 LB: > { %s377_s15 = sadd.s32 4294967295, %s619_s14   ;;  %s378_s16 = sadd.s32 4294967294, %s619_s14   ;;  %s619_s14 = sphi %s651_s14, %s19_s14   ;;  %s615_s13 = sphi %s649_s13, %s885_s13   ;;  %s611_s12 = sphi %s647_s12, %s884_s12   ;;  %s607_s11 = sphi %s645_s11, %s883_s11   ;;  %s603_s10 = sphi %s643_s10, %s882_s10   ;;  %s599_s9 = sphi %s641_s9, %s881_s9  }
   0x8   : > { %p53_p0 = scmp.ne.s32.totalorder %s603_s10, %s599_s9  ;;  %p675_p1 = scmp.eq.s32.totalorder %s377_s15, 0 }
   0x9   : > { %p679_p2 = scmp.eq.s32.totalorder %s377_s15, 1  ;;  %p111_p3 = scmp.eq.s32.totalorder %s378_s16, 1 }
   0xa   : > { %s866_s17 = scalar_select %p675_p1, 1, 0 }
   0xb   : > { %s867_s18 = scalar_select %p679_p2, 1, 0 }
   0xc   : > { %p685_p4 = por %p675_p1, %p53_p0  ;;  %p379_p5 = scmp.ge.s32.totalorder %s619_s14, 1 }
   0xd   : > { %p690_p6 = por %p111_p3, %p53_p0  ;;  %p118_p7 = scmp.lt.s32.totalorder %s619_s14, 3 }
   0xe   : > { %s868_s19 = scalar_select %p685_p4, 1, 0 }
   0xf   : > { %s869_s20 = scalar_select %p690_p6, 1, 0 }
  0x10   : > { %p695_p8 = pnand %p379_p5, %p118_p7  ;;  %s621_s22 = smov [#allocation5]  }
  0x11   : > { %s132_s23 = sshll.u32 %s621_s22, 4  ;;  %s28_s25 = sadd.s32 1, %s615_s13  ;;  %s133_s23 = int_to_ptr.vmem [resolvable:$true] %s132_s23 }
  0x12   : > { %s870_s21 = scalar_select %p695_p8, 1, 0 }
  0x13   : > { %p408_p9 = pneg %p695_p8  ;;  %s475_s28 = scalar_lea.hbm %s860_s1, 1024 }
  0x14   : > { %p476_p12 = scmp.ne.s32.totalorder %s860_s1, %s475_s28  ;;  %p482_p5 = scmp.lt.u32.totalorder %s475_s28, %s860_s1 }
  0x15   : > { %p704_p11 = pnand %p408_p9, %p675_p1 }
  0x17   : > { %p477_p13 = pneg %p704_p11 }
  0x19   : > { %p478_p0 = pnand %p477_p13, %p476_p12 }
  0x1b   : > { %p479_p3 = pneg %p478_p0 }
  0x1d   : > { %p484_p7 = pnand %p482_p5, %p479_p3 }
  0x1f   : > { %487 = shalt.err (!%p484_p7)
}
  0x20   : > { %s488_s5 = scalar_lea.vmem %s133_s23, 1024  ;;  %p496_p1 = scmp.lt.s32.totalorder %s133_s23, %s133_s23 }
  0x21   : > { %p489_p9 = scmp.ne.s32.totalorder %s133_s23, %s488_s5  ;;  %p497_p4 = scmp.lt.s32.totalorder %s488_s5, %s488_s5 }
  0x23   : > { %p491_p10 = pnand %p489_p9, %p477_p13  ;;  %p498_p8 = por %p497_p4, %p496_p1 }
  0x25   : > { %p492_p6 = pneg %p491_p10 }
  0x27   : > { %p499_p2 = pnand %p498_p8, %p492_p6 }
  0x29   : > { %502 = shalt.err (!%p499_p2)
}
  0x2a   : > { %s622_s6 = smov 128   ;;  %s623_s7 = smov 8  }
  0x2b   : > { %411 = dma.hbm_to_vmem [thread:$0]  (!%p704_p11), %s860_s1, 1024, %s133_s23, [#allocation6], %s622_s6, %s622_s6, %s623_s7  }
  0x2c   : > { %p29_p1 = scmp.ge.s32.totalorder %s28_s25, 2  ;;  %s40_s16 = sadd.s32 1, %s607_s11 }
  0x2d   : > { %p47_p2 = scmp.ne.s32.totalorder %s607_s11, %s603_s10  ;;  %p48_p4 = scmp.eq.s32.totalorder %s619_s14, 0 }
  0x2e   : > { %s887_s25 = smov (%p29_p1, %s28_s25), 0  ;;  %p873_p8 = scmp.ne.s32.totalorder %s867_s18, 0 }
  0x2f   : > { %p731_p6 = por %p48_p4, %p47_p2  ;;  %s35_s24 = ssub.s32 %s615_s13, %s887_s25 }
  0x30   : > { %p737_p10 = por %p873_p8, %p47_p2  ;;  %p421_p12 = scmp.lt.s32.totalorder %s619_s14, 2 }
  0x31   : > { %p38_p11 = scmp.eq.s32.totalorder %s35_s24, 0  ;;  %s146_s23 = sand.u32 1, %s607_s11  }
  0x32   : > { %s382_s27 = sshll.u32 %s146_s23, 3  ;;  %s383_s29 = sshll.u32 %s615_s13, 7 }
  0x33   : > { %s746_s28 = scalar_select %p38_p11, %s607_s11, %s40_s16  }
  0x34   : > { %s752_s4 = scalar_lea.hbm %s859_s0, %s383_s29  ;;  %s150_s18 = scalar_lea.vmem [#allocation2], %s382_s27 }
  0x35   : > { %s158_s5 = sshll.u32 %s150_s18, 4  ;;  %p758_p13 = pnand %p421_p12, %p731_p6  ;;  %s754_s5 = int_to_ptr.vmem [resolvable:$true] %s158_s5 }
  0x36   : > { %s147_s7 = scalar_lea.sflag [#allocation3], %s146_s23  ;;  %s503_s8 = scalar_lea.hbm %s752_s4, 128 }
  0x37   : > { %p504_p0 = scmp.ne.s32.totalorder %s752_s4, %s503_s8  ;;  %p505_p3 = pneg %p758_p13 }
  0x38   : > { %s508_s24 = scalar_lea.hbm %s859_s0, 256  ;;  %p509_p9 = scmp.lt.u32.totalorder %s752_s4, %s859_s0 }
  0x39   : > { %p506_p5 = pnand %p505_p3, %p504_p0  ;;  %p510_p1 = scmp.lt.u32.totalorder %s508_s24, %s503_s8 }
  0x3a   : > { %p512_p4 = scmp.lt.u32.totalorder %s503_s8, %s752_s4 }
  0x3b   : > { %p507_p7 = pneg %p506_p5  ;;  %p511_p2 = por %p510_p1, %p509_p9 }
  0x3d   : > { %p513_p6 = por %p512_p4, %p511_p2 }
  0x3f   : > { %p514_p8 = pnand %p513_p6, %p507_p7 }
  0x41   : > { %517 = shalt.err (!%p514_p8)
}
  0x42   : > { %s518_s23 = scalar_lea.vmem %s754_s5, 128  ;;  %s624_s29 = smov [#allocation2]  }
  0x43   : > { %p519_p12 = scmp.ne.s32.totalorder %s754_s5, %s518_s23  ;;  %s523_s30 = sshll.u32 %s624_s29, 4  ;;  %s524_s30 = int_to_ptr.vmem [resolvable:$false] %s523_s30 }
  0x44   : > { %s525_s3 = scalar_lea.vmem %s524_s30, 256  ;;  %p526_p5 = scmp.lt.s32.totalorder %s754_s5, %s524_s30 }
  0x45   : > { %p521_p11 = pnand %p519_p12, %p505_p3  ;;  %p527_p9 = scmp.lt.s32.totalorder %s525_s3, %s518_s23 }
  0x47   : > { %p522_p0 = pneg %p521_p11  ;;  %p528_p1 = por %p527_p9, %p526_p5 }
  0x49   : > { %p529_p2 = pnand %p528_p1, %p522_p0 }
  0x4b   : > { %532 = shalt.err (!%p529_p2)
}
  0x4c   : > { %415 = dma.hbm_to_vmem [thread:$0]  (!%p758_p13), %s752_s4, 128, %s754_s5, %s147_s7  }
  0x4d   : > { %p876_p7 = scmp.ne.s32.totalorder %s870_s21, 0 }
  0x4e   : > { %s790_s18 = sand.u32 (!%p876_p7), 1, %s603_s10   ;;  %p877_p3 = scmp.ne.s32.totalorder (!%p876_p7), %s868_s19, 0 }
  0x4f   : > { %167 = sbr.rel (%p876_p7) target bundleno = 122 (0x7a), region = 28  ;;  %s385_s8 = sshll.u32 (!%p876_p7), %s790_s18, 3 }
  0x50   : > { %s170_s15 = scalar_lea.sflag (!%p876_p7), [#allocation3], %s790_s18  ;;  %s173_s16 = scalar_lea.vmem (!%p876_p7), [#allocation2], %s385_s8 }
  0x56   : > { %586 = dma.done.wait (%p877_p3), %s170_s15, 128  }
  0x57   : > { %588 = vsyncadd (%p877_p3), %s170_s15, 4294967168  ;;  %p878_p13 = scmp.ne.s32.totalorder %s866_s17, 0 }
  0x59   : > { %590 = dma.done.wait (%p878_p13), [#allocation6], 1024  }
  0x5a   : > { %592 = vsyncadd (%p878_p13), [#allocation6], 4294966272  ;;  %v388_v0 = vld [vmem:[%s173_s16] ss:$0 sm:$0xff]  ;;  %v199_v1 = vld [vmem:[#allocation5] sm:$0xff]  ;;  %s197_s17 = scalar_lea.vmem [#allocation7], %s385_s8 }
  0x5b   : > { %v389_v2 = vld [vmem:[%s173_s16 + $0x1] ss:$0 sm:$0xff]  ;;  %v204_v3 = vmul.f32 %v388_v0, %v199_v1  ;;  %v208_v4 = vld [vmem:[#allocation5 + $0x8] sm:$0xff]  ;;  %v390_v5 = vld [vmem:[%s173_s16 + $0x2] ss:$0 sm:$0xff]  ;;  %s285_s19 = sshll.u32 %s197_s17, 4  ;;  %s807_s19 = int_to_ptr.vmem [resolvable:$true] %s285_s19 }
  0x5c   : > { %v217_v6 = vld [vmem:[#allocation5 + $0x10] sm:$0xff]  ;;  %v213_v7 = vmul.f32 %v389_v2, %v208_v4  ;;  %v226_v10 = vld [vmem:[#allocation5 + $0x18] sm:$0xff]  ;;  %v235_v12 = vld [vmem:[#allocation5 + $0x20] sm:$0xff]  ;;  %s397_s21 = sshll.u32 %s611_s12, 7  ;;  %s271_s7 = scalar_lea.sflag [#allocation4], %s790_s18 }
  0x5d   : > { %v222_v8 = vmul.f32 %v390_v5, %v217_v6  ;;  %v391_v9 = vld [vmem:[%s173_s16 + $0x3] ss:$0 sm:$0xff]  ;;  %v392_v11 = vld [vmem:[%s173_s16 + $0x4] ss:$0 sm:$0xff]  ;;  %v393_v15 = vld [vmem:[%s173_s16 + $0x5] ss:$0 sm:$0xff]  ;;  %s812_s6 = scalar_lea.hbm %s861_s2, %s397_s21 }
  0x5e   : > { %v214_v13 = vadd.f32 %v213_v7, %v204_v3  ;;  %v231_v14 = vmul.f32 %v391_v9, %v226_v10  ;;  %v244_v16 = vld [vmem:[#allocation5 + $0x28] sm:$0xff]  ;;  %v240_v18 = vmul.f32 %v392_v11, %v235_v12  ;;  %v394_v19 = vld [vmem:[%s173_s16 + $0x6] ss:$0 sm:$0xff]  ;;  %v395_v23 = vld [vmem:[%s173_s16 + $0x7] ss:$0 sm:$0xff]  ;;  %s533_s24 = scalar_lea.vmem %s807_s19, 128 }
  0x5f   : > { %v253_v20 = vld [vmem:[#allocation5 + $0x30] sm:$0xff]  ;;  %v249_v22 = vmul.f32 %v393_v15, %v244_v16  ;;  %v262_v24 = vld [vmem:[#allocation5 + $0x38] sm:$0xff]  ;;  %p534_p4 = scmp.ne.s32.totalorder %s807_s19, %s533_s24  ;;  %s625_s12 = smov [#allocation7]  }
  0x60   : > { %v223_v17 = vadd.f32 %v222_v8, %v214_v13  ;;  %v258_v26 = vmul.f32 %v394_v19, %v253_v20  ;;  %v267_v28 = vmul.f32 %v395_v23, %v262_v24  ;;  %s537_s22 = sshll.u32 %s625_s12, 4  ;;  %s538_s22 = int_to_ptr.vmem [resolvable:$false] %s537_s22 }
  0x61   : > { %p535_p6 = pnand %p534_p4, %p737_p10  ;;  %s539_s27 = scalar_lea.vmem %s538_s22, 256 }
  0x62   : > { %v232_v21 = vadd.f32 %v231_v14, %v223_v17  ;;  %p540_p12 = scmp.lt.s32.totalorder %s807_s19, %s538_s22  ;;  %p541_p11 = scmp.lt.s32.totalorder %s539_s27, %s533_s24 }
  0x63   : > { %p536_p8 = pneg %p535_p6 }
  0x64   : > { %v241_v25 = vadd.f32 %v240_v18, %v232_v21  ;;  %p542_p0 = por %p541_p11, %p540_p12 }
  0x66   : > { %v250_v27 = vadd.f32 %v249_v22, %v241_v25  ;;  %p543_p5 = pnand %p542_p0, %p536_p8 }
  0x68   : > { %v259_v29 = vadd.f32 %v258_v26, %v250_v27 }
  0x6a   : > { %v268_v30 = vadd.f32 %v267_v28, %v259_v29 }
  0x6c   : > { %269 = vst [vmem:[%s197_s17] sm:$0xff] %v268_v30 }
  0x6d   : > { %546 = shalt.err (!%p543_p5)
}
  0x6e   : > { %s547_s23 = scalar_lea.hbm %s812_s6, 128  ;;  %s551_s3 = scalar_lea.hbm %s861_s2, 256 }
  0x6f   : > { %p548_p9 = scmp.ne.s32.totalorder %s812_s6, %s547_s23  ;;  %p552_p7 = scmp.lt.u32.totalorder %s812_s6, %s861_s2 }
  0x70   : > { %p553_p3 = scmp.lt.u32.totalorder %s551_s3, %s547_s23  ;;  %p555_p4 = scmp.lt.u32.totalorder %s547_s23, %s812_s6 }
  0x71   : > { %p549_p1 = pnand %p548_p9, %p737_p10 }
  0x72   : > { %p554_p13 = por %p553_p3, %p552_p7 }
  0x73   : > { %p550_p2 = pneg %p549_p1 }
  0x74   : > { %p556_p6 = por %p555_p4, %p554_p13 }
  0x76   : > { %p557_p8 = pnand %p556_p6, %p550_p2 }
  0x78   : > { %560 = shalt.err (!%p557_p8)
}
  0x79   : > { %406 = dma.vmem_to_hbm [thread:$0]  (%p737_p10), %s807_s19, 128, %s812_s6, %s271_s7  }
  0x7a PF: > { %s297_s15 = sand.u32 1, %s599_s9   ;;  %p879_p12 = scmp.ne.s32.totalorder %s869_s20, 0 }
  0x7b   : > { %p880_p11 = scmp.ge.s32.totalorder %s619_s14, 2  ;;  %s298_s16 = scalar_lea.sflag [#allocation4], %s297_s15 }
  0x7d   : > { %p417_p0 = pnand %p880_p11, %p879_p12 }
  0x7f   : > { %594 = dma.done.wait (!%p417_p0), %s298_s16, 128  }
  0x80   : > { %596 = vsyncadd (!%p417_p0), %s298_s16, 4294967168  ;;  %s19_s14 = sadd.s32 1, %s619_s14   ;;  %s881_s9 = smov %s603_s10 }
  0x81   : > { %p16_p5 = scmp.ge.s32.totalorder %s19_s14, 4   ;;  %s882_s10 = smov %s607_s11 }
  0x82   : > { %s883_s11 = smov %s746_s28  ;;  %s884_s12 = smov %s615_s13 }
  0x83   : > { %s885_s13 = smov %s887_s25  ;;  %18 = sbr.rel (!%p16_p5) target bundleno = 7 (0x7), region = 85 }
  0x8a   :  { %303 = vsyncpa [#allocation3], 1 }
  0x8b   :  { %305 = vsyncpa [#allocation3 + $0x1], 1 }
  0x8c   :  { %306 = vsyncpa [#allocation6], 1 }
  0x8d   :  { %307 = vsyncpa [#allocation4], 1 }
  0x8e   :  { %309 = vsyncpa [#allocation4 + $0x1], 1 }

</bundles_post_ra>
